<compile_context>
chip_gen: v7x
topology: tpu7x:2x2x1
jax: 0.10.0
libtpu: 0.0.40
codegen_flags: <defaults>
</compile_context>

<pallas_src>
import functools
import math

import jax
import jax.numpy as jnp
from jax.experimental import pallas as pl
from jax.experimental.pallas import tpu as pltpu


def _round_up(n, m):
    return ((n + m - 1) // m) * m


def _vmem_capacity_bytes():
    try:
        return int(pltpu.get_tpu_info().vmem_capacity_bytes)
    except Exception:
        # Conservative fallback: assume the smallest per-TC VMEM (v7x, 64 MiB).
        return 64 * 1024 * 1024


def _layer_norm_kernel(x_ref, w_ref, b_ref, o_ref, *, eps):
    """Normalize a (TR, H) slab of independent rows, stats in f32."""
    x = x_ref[...].astype(jnp.float32)
    inv_h = 1.0 / float(x.shape[-1])

    # Two-pass centered statistics (apex / F.layer_norm numerical parity).
    mean = jnp.sum(x, axis=-1, keepdims=True) * inv_h
    xc = x - mean
    var = jnp.sum(xc * xc, axis=-1, keepdims=True) * inv_h
    inv_std = jax.lax.rsqrt(var + eps)

    # NOTE: on the ragged final row block, rows past R hold uninitialized VMEM;
    # they may produce inf/nan here (harmless - no FP traps on TPU) and Pallas
    # masks the store so they are never written back.
    y = xc * inv_std * w_ref[...] + b_ref[...]      # w/b already f32
    o_ref[...] = y.astype(o_ref.dtype)


def mixed_fused_layer_norm(x, weight, bias, normalized_shape, eps=1e-5):
    """LayerNorm over the trailing `normalized_shape` dims of x (f32 stats)."""
    if isinstance(normalized_shape, int):
        normalized_shape = (normalized_shape,)
    normalized_shape = tuple(normalized_shape)
    n_norm = len(normalized_shape)
    assert tuple(x.shape[-n_norm:]) == normalized_shape, (
        f"trailing dims {x.shape[-n_norm:]} != normalized_shape {normalized_shape}")

    lead_shape = x.shape[:-n_norm]
    H = math.prod(normalized_shape)
    R = math.prod(lead_shape) if lead_shape else 1

    x2 = x.reshape(R, H)                               # no pad: block last dim == H
    w2 = weight.reshape(1, H).astype(jnp.float32)      # pre-cast once in wrapper
    b2 = bias.reshape(1, H).astype(jnp.float32)

    # ---- Row-tile selection -------------------------------------------------
    vmem_cap = _vmem_capacity_bytes()
    # ~4 MiB f32 working set per block on 64 MiB-VMEM parts (v7x),
    # ~8 MiB on 128 MiB parts (v5e/v6e).
    f32_budget_bytes = (4 << 20) if vmem_cap <= (64 << 20) else (8 << 20)
    R8 = _round_up(R, 8)
    TR = max(8, ((f32_budget_bytes // 4) // H) // 8 * 8)
    TR = min(TR, R8)
    # Prefer >= 4 grid steps (>= 2 per v7x TensorCore) when there are enough
    # rows, so both cores get work and the double-buffer reaches steady state.
    if R8 >= 4 * 8:
        TR = min(TR, max(8, _round_up(pl.cdiv(R, 4), 8)))
    steps = pl.cdiv(R, TR)
    # A small odd step count leaves one v7x core with an extra block (up to
    # ~33% tail imbalance); shrink TR (keeping a multiple of 8 sublanes) if a
    # nearby even split exists.  Best-effort - not always achievable.
    if 1 < steps <= 8 and steps % 2 == 1:
        for cand in range(TR - 8, 7, -8):
            if pl.cdiv(R, cand) % 2 == 0:
                TR = cand
                break
        steps = pl.cdiv(R, TR)
    grid = (steps,)
    # TODO(synk): very large H (one 8-row f32 block overflowing the VMEM budget)
    # would need lane tiling + two-stage reduction; for tiny H (< 128, e.g. the
    # demo's 32) a packed/transposed layout would recover the unused lanes.
    # Neither is needed for typical hidden sizes.

    # ---- VMEM limit from actual need (not a flat 64 MiB ask) ----------------
    itemsize = jnp.dtype(x.dtype).itemsize
    blk_io = TR * H * itemsize            # one input / output block
    blk_f32 = TR * H * 4                  # one f32 temporary tile
    need = 2 * blk_io + 2 * blk_io + 3 * blk_f32 + 4 * H * 4   # 2x in, 2x out, temps, w/b
    vmem_limit = int(min(vmem_cap - (16 << 20),                # <= 48 MiB on v7x
                         max(32 << 20, need + (8 << 20))))     # need + headroom

    out2 = pl.pallas_call(
        functools.partial(_layer_norm_kernel, eps=float(eps)),
        out_shape=jax.ShapeDtypeStruct((R, H), x.dtype),
        grid=grid,
        in_specs=[
            pl.BlockSpec((TR, H), lambda i: (i, 0)),   # x row tile
            pl.BlockSpec((1, H), lambda i: (0, 0)),    # weight (index-invariant)
            pl.BlockSpec((1, H), lambda i: (0, 0)),    # bias   (index-invariant)
        ],
        out_specs=pl.BlockSpec((TR, H), lambda i: (i, 0)),
        compiler_params=pltpu.CompilerParams(
            dimension_semantics=("parallel",),
            vmem_limit_bytes=vmem_limit,
        ),
    )(x2, w2, b2)

    return out2.reshape(x.shape)


class MixedFusedLayerNormJAX:
    """Minimal JAX analogue of oslo's MixedFusedLayerNorm (elementwise_affine=True)."""

    def __init__(self, normalized_shape, eps=1e-5):
        if isinstance(normalized_shape, int):
            normalized_shape = (normalized_shape,)
        self.normalized_shape = tuple(normalized_shape)
        self.eps = eps
        # reset_parameters(): weight = ones, bias = zeros (deterministic).
        self.weight = jnp.ones(self.normalized_shape, dtype=jnp.float32)
        self.bias = jnp.zeros(self.normalized_shape, dtype=jnp.float32)

    def __call__(self, x):
        return mixed_fused_layer_norm(
            x, self.weight, self.bias, self.normalized_shape, self.eps)


if __name__ == "__main__":
    key = jax.random.PRNGKey(0)
    batch, seq, hidden = 2, 8, 32
    x = jax.random.normal(key, (batch, seq, hidden), dtype=jnp.float32)

    m = MixedFusedLayerNormJAX(hidden, eps=1e-5)
    y = m(x)
    y = jax.block_until_ready(y)

    # Pure-JAX reference for a sanity check.
    mean = jnp.mean(x, axis=-1, keepdims=True)
    var = jnp.mean((x - mean) ** 2, axis=-1, keepdims=True)
    y_ref = (x - mean) / jnp.sqrt(var + 1e-5) * m.weight + m.bias

    assert y.shape == x.shape and y.dtype == x.dtype
    assert jnp.allclose(y, y_ref, atol=1e-5, rtol=1e-5)
    print("KERNEL_OK")
</pallas_src>

<mosaic_0001>
module attributes {stable_mosaic.version = 11 : i64} {
  func.func @_layer_norm_kernel(%arg0: i32, %arg1: memref<16x32xf32, #tpu.memory_space<vmem>>, %arg2: memref<1x32xf32, #tpu.memory_space<vmem>>, %arg3: memref<1x32xf32, #tpu.memory_space<vmem>>, %arg4: memref<16x32xf32, #tpu.memory_space<vmem>>) attributes {dimension_semantics = [#tpu.dimension_semantics<parallel>], iteration_bounds = array<i64: 1>, scalar_prefetch = 0 : i64, scratch_operands = 0 : i64, tpu.core_type = #tpu.core_type<tc>, window_params = [{transform_indices = @transform_0, window_bounds = array<i64: 16, 32>}, {pipeline_mode = #tpu.pipeline_mode<synchronous>, transform_indices = @transform_1, window_bounds = array<i64: 1, 32>}, {pipeline_mode = #tpu.pipeline_mode<synchronous>, transform_indices = @transform_2, window_bounds = array<i64: 1, 32>}, {transform_indices = @transform_3, window_bounds = array<i64: 16, 32>}]} {
    %c0 = arith.constant 0 : index
    %c0_0 = arith.constant 0 : index
    %0 = vector.load %arg1[%c0, %c0_0] : memref<16x32xf32, #tpu.memory_space<vmem>>, vector<16x32xf32>
    %cst = arith.constant dense<0.000000e+00> : vector<16xf32>
    %1 = vector.multi_reduction <add>, %0, %cst [1] : vector<16x32xf32> to vector<16xf32>
    %2 = vector.shape_cast %1 : vector<16xf32> to vector<16x1xf32>
    %cst_1 = arith.constant 3.125000e-02 : f32
    %3 = vector.broadcast %cst_1 : f32 to vector<16x1xf32>
    %4 = arith.mulf %2, %3 : vector<16x1xf32>
    %5 = vector.broadcast %4 : vector<16x1xf32> to vector<16x32xf32>
    %6 = arith.subf %0, %5 : vector<16x32xf32>
    %7 = arith.mulf %6, %6 : vector<16x32xf32>
    %cst_2 = arith.constant dense<0.000000e+00> : vector<16xf32>
    %8 = vector.multi_reduction <add>, %7, %cst_2 [1] : vector<16x32xf32> to vector<16xf32>
    %9 = vector.shape_cast %8 : vector<16xf32> to vector<16x1xf32>
    %cst_3 = arith.constant 3.125000e-02 : f32
    %10 = vector.broadcast %cst_3 : f32 to vector<16x1xf32>
    %11 = arith.mulf %9, %10 : vector<16x1xf32>
    %cst_4 = arith.constant 9.99999974E-6 : f32
    %12 = vector.broadcast %cst_4 : f32 to vector<16x1xf32>
    %13 = arith.addf %11, %12 : vector<16x1xf32>
    %14 = math.rsqrt %13 : vector<16x1xf32>
    %15 = vector.broadcast %14 : vector<16x1xf32> to vector<16x32xf32>
    %16 = arith.mulf %6, %15 : vector<16x32xf32>
    %c0_5 = arith.constant 0 : index
    %c0_6 = arith.constant 0 : index
    %17 = vector.load %arg2[%c0_5, %c0_6] : memref<1x32xf32, #tpu.memory_space<vmem>>, vector<1x32xf32>
    %18 = vector.broadcast %17 : vector<1x32xf32> to vector<16x32xf32>
    %19 = arith.mulf %16, %18 : vector<16x32xf32>
    %c0_7 = arith.constant 0 : index
    %c0_8 = arith.constant 0 : index
    %20 = vector.load %arg3[%c0_7, %c0_8] : memref<1x32xf32, #tpu.memory_space<vmem>>, vector<1x32xf32>
    %21 = vector.broadcast %20 : vector<1x32xf32> to vector<16x32xf32>
    %22 = arith.addf %19, %21 : vector<16x32xf32>
    %c0_9 = arith.constant 0 : index
    %c0_10 = arith.constant 0 : index
    %23 = vector.load %arg4[%c0_9, %c0_10] : memref<16x32xf32, #tpu.memory_space<vmem>>, vector<16x32xf32>
    tpu.vector_store %arg4[%c0_9, %c0_10], %22 {strides = array<i32>} : memref<16x32xf32, #tpu.memory_space<vmem>>, vector<16x32xf32>,
    return
  }
  func.func @transform_0(%arg0: i32) -> (i32, i32) {
    %c0_i32 = arith.constant 0 : i32
    %c0_i32_0 = arith.constant 0 : i32
    return %arg0, %c0_i32 : i32, i32
  }
  func.func @transform_1(%arg0: i32) -> (i32, i32) {
    %c0_i32 = arith.constant 0 : i32
    %c0_i32_0 = arith.constant 0 : i32
    %c0_i32_1 = arith.constant 0 : i32
    return %c0_i32, %c0_i32_0 : i32, i32
  }
  func.func @transform_2(%arg0: i32) -> (i32, i32) {
    %c0_i32 = arith.constant 0 : i32
    %c0_i32_0 = arith.constant 0 : i32
    %c0_i32_1 = arith.constant 0 : i32
    return %c0_i32, %c0_i32_0 : i32, i32
  }
  func.func @transform_3(%arg0: i32) -> (i32, i32) {
    %c0_i32 = arith.constant 0 : i32
    %c0_i32_0 = arith.constant 0 : i32
    return %arg0, %c0_i32 : i32, i32
  }
}

</mosaic_0001>

<bundles_post_ra>
// kernel: tpu_custom_call.1
= control target key start
LH: loop header
LB: loop body
LE: loop exit
PB: predicated region body
PF: predicated region fallthrough
CT: control target
= control target key end

     0   :  { %8 = vsyncpa [#allocation3], 0  ;;  %s219_s0 = inlined_call_operand.hbm [shape: f32[16,32], index: 0, kind: input, shape index: {}]   ;;  %s220_s1 = inlined_call_operand.vmem [shape: f32[1,32], index: 1, kind: input, shape index: {}]   ;;  %s221_s2 = inlined_call_operand.vmem [shape: f32[1,32], index: 2, kind: input, shape index: {}]   ;;  %s222_s3 = inlined_call_operand.hbm [shape: f32[16,32], index: 3, kind: output, shape index: {}]  }
   0x1   :  { %9 = vsyncpa [#allocation4], 0  ;;  %s153_s12 = smov [#allocation2]   ;;  %s105_s16 = scalar_lea.hbm %s219_s0, 256 }
   0x2   :  { %s15_s13 = sshll.u32 %s153_s12, 4  ;;  %p106_p0 = scmp.ne.s32.totalorder %s219_s0, %s105_s16  ;;  %s16_s13 = int_to_ptr.vmem [resolvable:$true] %s15_s13 }
   0x3   :  { %p109_p1 = scmp.lt.u32.totalorder %s105_s16, %s219_s0 }
   0x5   :  { %p111_p2 = pnand %p109_p1, %p106_p0 }
   0x7   :  { %114 = shalt.err (!%p111_p2)
}
   0x8   :  { %s115_s21 = scalar_lea.vmem %s16_s13, 256  ;;  %p120_p4 = scmp.lt.s32.totalorder %s16_s13, %s16_s13 }
   0x9   :  { %p116_p3 = scmp.ne.s32.totalorder %s16_s13, %s115_s21  ;;  %p121_p5 = scmp.lt.s32.totalorder %s115_s21, %s115_s21 }
   0xb   :  { %p122_p6 = por %p121_p5, %p120_p4 }
   0xd   :  { %p123_p7 = pnand %p122_p6, %p116_p3 }
   0xf   :  { %126 = shalt.err (!%p123_p7)
}
  0x10   :  { %s154_s22 = smov 128   ;;  %s155_s23 = smov 8  }
  0x11   :  { %21 = dma.hbm_to_vmem [thread:$0]  %s219_s0, 256, %s16_s13, [#allocation3], %s154_s22, %s154_s22, %s155_s23  }
  0x12   :  { %149 = dma.done.wait [#allocation3], 256  }
  0x13   :  { %150 = vsyncadd [#allocation3], 4294967040  ;;  %vm31_vm0 = vcmask 261120   ;;  %v29_v0 = vld [vmem:[#allocation2] sm:$0xff]  ;;  %v30_v1 = vld [vmem:[#allocation2 + $0x8] sm:$0xff]  ;;  %s156_s29 = smov [#allocation5]  }
  0x14   :  { %v32_v2 = vsel %vm31_vm0, %v29_v0, 0.0  ;;  %v35_v3 = vsel %vm31_vm0, %v30_v1, 0.0  ;;  %v95_v21 = vld [vmem:[%s220_s1] ss:$0 sm:$0xff]  ;;  %s83_s30 = sshll.u32 %s156_s29, 4  ;;  %s84_s30 = int_to_ptr.vmem [resolvable:$true] %s83_s30 }
  0x15   :  { %33 = vadd.xlane.f32.xlu0 %v32_v2  ;;  %v96_v23 = vld [vmem:[%s221_s2] ss:$0 sm:$0xff]  ;;  %s127_s4 = scalar_lea.vmem %s84_s30, 256  ;;  %p132_p9 = scmp.lt.s32.totalorder %s84_s30, %s84_s30 }
  0x16   :  { %p128_p8 = scmp.ne.s32.totalorder %s84_s30, %s127_s4  ;;  %p133_p10 = scmp.lt.s32.totalorder %s127_s4, %s127_s4 }
  0x18   :  { %p134_p11 = por %p133_p10, %p132_p9 }
  0x19   :  { %36 = vadd.xlane.f32.xlu0 %v35_v3 }
  0x1a   :  { %p135_p12 = pnand %p134_p11, %p128_p8 }
  0xa2   :  { %v34_v4 = vpop.xlane.xlu0 %33 }
  0xa3   :  { %v38_v5 = vmul.f32 0.03125, %v34_v4 }
  0xa5   :  { %v40_v6 = vsub.f32 %v29_v0, %v38_v5 }
  0xa6   :  { %v37_v7 = vpop.xlane.xlu0 %36 }
  0xa7   :  { %v39_v8 = vmul.f32 0.03125, %v37_v7  ;;  %v42_v9 = vmul.f32 %v40_v6, %v40_v6 }
  0xa9   :  { %v41_v10 = vsub.f32 %v30_v1, %v39_v8  ;;  %v44_v11 = vsel %vm31_vm0, %v42_v9, 0.0 }
  0xaa   :  { %45 = vadd.xlane.f32.xlu1 %v44_v11 }
  0xab   :  { %v43_v12 = vmul.f32 %v41_v10, %v41_v10 }
  0xad   :  { %v47_v13 = vsel %vm31_vm0, %v43_v12, 0.0 }
  0xae   :  { %48 = vadd.xlane.f32.xlu1 %v47_v13 }
 0x137   :  { %v46_v14 = vpop.xlane.xlu1 %45 }
 0x138   :  { %v50_v15 = vmul.f32 0.03125, %v46_v14 }
 0x13a   :  { %v52_v16 = vadd.f32 1e-05, %v50_v15 }
 0x13b   :  { %v49_v17 = vpop.xlane.xlu1 %48 }
 0x13c   :  { %101 = vrsqrt.f32 %v52_v16  ;;  %v51_v18 = vmul.f32 0.03125, %v49_v17 }
 0x13e   :  { %v53_v19 = vadd.f32 1e-05, %v51_v18 }
 0x140   :  { %103 = vrsqrt.f32 %v53_v19 }
 0x146   :  { %v102_v20 = vpop.eup %101 }
 0x147   :  { %v56_v22 = vmul.f32 %v102_v20, %v40_v6 }
 0x149   :  { %v65_v24 = vmul.f32 %v95_v21, %v56_v22 }
 0x14a   :  { %v104_v25 = vpop.eup %103 }
 0x14b   :  { %v57_v26 = vmul.f32 %v104_v25, %v41_v10  ;;  %v74_v27 = vadd.f32 %v96_v23, %v65_v24 }
 0x14d   :  { %v66_v28 = vmul.f32 %v95_v21, %v57_v26  ;;  %76 = vst.msk [vmem:[#allocation5] sm:$0xff] %vm31_vm0, %v74_v27 }
 0x14f   :  { %v75_v29 = vadd.f32 %v96_v23, %v66_v28 }
 0x151   :  { %77 = vst.msk [vmem:[#allocation5 + $0x8] sm:$0xff] %vm31_vm0, %v75_v29 }
 0x152   :  { %138 = shalt.err (!%p135_p12)
}
 0x153   :  { %s139_s5 = scalar_lea.hbm %s222_s3, 256 }
 0x154   :  { %p140_p13 = scmp.ne.s32.totalorder %s222_s3, %s139_s5  ;;  %p143_p0 = scmp.lt.u32.totalorder %s139_s5, %s222_s3 }
 0x156   :  { %p145_p1 = pnand %p143_p0, %p140_p13 }
 0x158   :  { %148 = shalt.err (!%p145_p1)
}
 0x159   :  { %89 = dma.vmem_to_hbm [thread:$0]  %s84_s30, 256, %s222_s3, [#allocation4], %s154_s22, %s154_s22, %s155_s23  }
 0x15a   :  { %151 = dma.done.wait [#allocation4], 256  }
 0x15b   :  { %152 = vsyncadd [#allocation4], 4294967040 }
 0x15c   :  { %93 = vsyncpa [#allocation3], 1 }
 0x15d   :  { %94 = vsyncpa [#allocation4], 1 }

</bundles_post_ra>
